<compile_context>
chip_gen: v5e
topology: v5e:2x2
jax: 0.10.0
libtpu: 0.0.40
codegen_flags: <defaults>
</compile_context>

<pallas_src>
import jax
import jax.numpy as jnp
from jax.experimental import pallas as pl
from jax.experimental.pallas import tpu as pltpu


def _round_up(x, m):
    return ((x + m - 1) // m) * m


def _vmem_budget_bytes():
    """~50% of physical VMEM for this kernel's tiles (64 MiB v5e/v6e, 32 MiB v7x)."""
    try:
        cap = int(pltpu.get_tpu_info().vmem_capacity_bytes)
    except Exception:  # interpret mode / older jax
        cap = 64 * 1024 * 1024
    return max(16 * 1024 * 1024, cap // 2)


def _choose_tn(K, Np, w_item):
    # Prefer an un-tiled N so weight/bias are grid-invariant (fetched once,
    # single-buffered); only tile N when the weight block itself is large.
    if K * Np * w_item <= 4 * 1024 * 1024:
        return Np
    for c in (512, 256, 128):
        if Np % c == 0:
            return c
    return Np


def _tm_candidates(M):
    if M <= 128:
        return [_round_up(max(M, 1), 16)]      # 16 -> bf16 sublane packing
    cands = [c for c in (1024, 512, 256, 128) if c <= M]
    pref = ([c for c in cands if M % c == 0 and M // c >= 4]  # big tiles, >=4 steps
            + [c for c in cands if M % c == 0]                # at least: no x padding
            + cands)                                          # last resort: pad rows
    out = []
    for c in pref:
        if c not in out:
            out.append(c)
    return out


def _tk_candidates(K):
    # Full K first (no K grid axis); otherwise MXU-depth-friendly chunks (>=256).
    return [K] + [c for c in (2048, 1024, 512, 256) if c < K and K % c == 0]


_HEADROOM = 2 * 1024 * 1024  # allowance for compiler-internal scratch


def _footprint_bytes(tm, tn, tk, K, grid_n, x_item, w_item, out_item):
    ktiled = tk != K
    w_bufs = 2 if (ktiled or grid_n > 1) else 1
    b_bufs = 1 if grid_n == 1 else 2
    f = (2 * tm * tk * x_item          # x tiles, double-buffered
         + w_bufs * tk * tn * w_item   # weight tiles
         + b_bufs * tn * 4             # bias tiles (f32)
         + 2 * tm * tn * out_item)     # output tiles, double-buffered
    if ktiled:
        f += tm * tn * 4               # f32 accumulator scratch
    return f


def _plan_tiles(M, K, Np, x_item, w_item, out_item, budget, tm=None, tn=None):
    if tn is None:
        tn = _choose_tn(K, Np, w_item)
    assert Np % tn == 0 and tn % 128 == 0
    grid_n = Np // tn
    tm_list = [tm] if tm is not None else _tm_candidates(M)
    tk_list = _tk_candidates(K)
    for tm_ in tm_list:
        for tk_ in tk_list:
            fp = _footprint_bytes(tm_, tn, tk_, K, grid_n, x_item, w_item, out_item)
            if fp + _HEADROOM <= budget:
                return tm_, tn, tk_, fp
    tm_, tk_ = tm_list[-1], tk_list[-1]        # nothing fits cleanly: smallest tiles
    return tm_, tn, tk_, _footprint_bytes(tm_, tn, tk_, K, grid_n,
                                          x_item, w_item, out_item)


# ----------------------------- kernel bodies --------------------------------

def _sine_kernel(x_ref, w_ref, b_ref, o_ref):
    # x_ref: (tm, K) native dtype; w_ref: (K, tn) bf16 (omega pre-folded);
    # b_ref: (1, tn) f32 (omega pre-folded); o_ref: (tm, tn).
    w = w_ref[...]
    acc = jnp.dot(x_ref[...].astype(w.dtype), w,
                  preferred_element_type=jnp.float32)
    o_ref[...] = jnp.maximum(acc + b_ref[...], 0.0).astype(o_ref.dtype)


def _sine_kernel_ktiled(x_ref, w_ref, b_ref, o_ref, acc_ref):
    k = pl.program_id(2)

    @pl.when(k == 0)
    def _():
        acc_ref[...] = jnp.zeros_like(acc_ref)

    w = w_ref[...]
    acc_ref[...] += jnp.dot(x_ref[...].astype(w.dtype), w,
                            preferred_element_type=jnp.float32)

    @pl.when(k == pl.num_programs(2) - 1)
    def _():
        o_ref[...] = jnp.maximum(acc_ref[...] + b_ref[...], 0.0).astype(o_ref.dtype)


# ------------------------------- wrappers ------------------------------------

def prepare_sine_layer_params(weight_t, bias, omega_0,
                              compute_dtype=jnp.bfloat16):
    """One-time parameter prep: fold omega_0 into W and b, pad N to 128, cast W.

    weight_t: (in_features, out_features); bias: (out_features,).
    Returns (w_p (K, Np) compute_dtype, b_p (1, Np) f32, n_valid).
    """
    K, N = weight_t.shape
    assert bias.shape == (N,)
    Np = _round_up(N, 128)
    w_scaled = weight_t.astype(jnp.float32) * jnp.float32(omega_0)
    b_scaled = bias.astype(jnp.float32) * jnp.float32(omega_0)
    w_p = jnp.zeros((K, Np), compute_dtype).at[:, :N].set(
        w_scaled.astype(compute_dtype))
    b_p = jnp.zeros((1, Np), jnp.float32).at[0, :N].set(b_scaled)
    return w_p, b_p, N


def sine_layer(x, w_p, b_p, n_valid=None, *, tm=None, tn=None,
               out_dtype=None, keep_padded=False):
    """relu(omega_0 * (x @ W^T + b)) with omega already folded into w_p / b_p."""
    M, K = x.shape
    K2, Np = w_p.shape
    assert K == K2 and b_p.shape == (1, Np) and Np % 128 == 0
    if n_valid is None:
        n_valid = Np
    if out_dtype is None:
        out_dtype = x.dtype

    x_item = jnp.dtype(x.dtype).itemsize
    w_item = jnp.dtype(w_p.dtype).itemsize
    out_item = jnp.dtype(out_dtype).itemsize

    budget = _vmem_budget_bytes()
    tm, tn, tk, footprint = _plan_tiles(M, K, Np, x_item, w_item, out_item,
                                        budget, tm=tm, tn=tn)
    Mp = _round_up(M, tm)
    grid_m, grid_n, grid_k = Mp // tm, Np // tn, (K + tk - 1) // tk
    ktiled = grid_k > 1

    # x: only pad when the row tile does not divide the batch (no extra pass
    # over the dominant operand otherwise; dtype cast happens in-kernel).
    x_in = x if Mp == M else jnp.zeros((Mp, K), x.dtype).at[:M, :].set(x)

    wb_single = pl.Buffered(1)  # single-buffer grid-invariant param blocks
    if ktiled:
        in_specs = [
            pl.BlockSpec((tm, tk), lambda i, j, k: (i, k)),
            pl.BlockSpec((tk, tn), lambda i, j, k: (k, j)),
            (pl.BlockSpec((1, tn), lambda i, j, k: (0, j),
                          pipeline_mode=wb_single)
             if grid_n == 1 else
             pl.BlockSpec((1, tn), lambda i, j, k: (0, j))),
        ]
        out_specs = pl.BlockSpec((tm, tn), lambda i, j, k: (i, j))
        grid = (grid_m, grid_n, grid_k)
        scratch = [pltpu.VMEM((tm, tn), jnp.float32)]
        dims = ("parallel", "parallel", "arbitrary")
        kernel = _sine_kernel_ktiled
    else:
        if grid_n == 1:
            w_spec = pl.BlockSpec((K, tn), lambda i, j: (0, j),
                                  pipeline_mode=wb_single)
            b_spec = pl.BlockSpec((1, tn), lambda i, j: (0, j),
                                  pipeline_mode=wb_single)
        else:
            w_spec = pl.BlockSpec((K, tn), lambda i, j: (0, j))
            b_spec = pl.BlockSpec((1, tn), lambda i, j: (0, j))
        in_specs = [pl.BlockSpec((tm, K), lambda i, j: (i, 0)), w_spec, b_spec]
        out_specs = pl.BlockSpec((tm, tn), lambda i, j: (i, j))
        grid = (grid_m, grid_n)
        scratch = []
        dims = ("parallel", "parallel")
        kernel = _sine_kernel

    vmem_limit = int(min(max(4 * 1024 * 1024, footprint + _HEADROOM), 2 * budget))

    cost = pl.CostEstimate(
        flops=2 * M * K * n_valid,
        transcendentals=0,
        bytes_accessed=(M * K * x_item + K * Np * w_item + Np * 4
                        + Mp * Np * out_item),
    )

    out_p = pl.pallas_call(
        kernel,
        out_shape=jax.ShapeDtypeStruct((Mp, Np), out_dtype),
        grid_spec=pltpu.PrefetchScalarGridSpec(
            num_scalar_prefetch=0,
            grid=grid,
            in_specs=in_specs,
            out_specs=out_specs,
            scratch_shapes=scratch,
        ),
        compiler_params=pltpu.CompilerParams(
            dimension_semantics=dims,
            vmem_limit_bytes=vmem_limit,
        ),
        cost_estimate=cost,
    )(x_in, w_p, b_p)

    if Mp != M:
        out_p = out_p[:M]
    if not keep_padded and n_valid != Np:
        out_p = out_p[:, :n_valid]
    return out_p


def sine_layer_ref(x, w_p, b_p, n_valid, out_dtype):
    # Matched reference: same bf16 operands / f32 accumulation as the kernel.
    acc = jnp.dot(x.astype(w_p.dtype), w_p, preferred_element_type=jnp.float32)
    return jnp.maximum(acc + b_p, 0.0)[:, :n_valid].astype(out_dtype)


if __name__ == "__main__":
    key = jax.random.PRNGKey(0)
    k_x, k_w, k_b = jax.random.split(key, 3)

    batch = 512          # -> tm=128, grid (4, 1): pipelined, 2 steps per v7x TC
    in_features = 32
    out_features = 64    # padded to 128 lanes inside prepare_sine_layer_params
    omega_0 = 20.0

    # nn.Linear default init: U(-1/sqrt(in), 1/sqrt(in)); weight kept transposed.
    bound = 1.0 / (in_features ** 0.5)
    weight_t = jax.random.uniform(
        k_w, (in_features, out_features), jnp.float32, -bound, bound)
    bias = jax.random.uniform(k_b, (out_features,), jnp.float32, -bound, bound)
    x = jax.random.normal(k_x, (batch, in_features), jnp.float32)

    # One-time parameter prep (omega folded, N padded, bf16 weights).
    w_p, b_p, n_valid = prepare_sine_layer_params(weight_t, bias, omega_0)

    out = sine_layer(x, w_p, b_p, n_valid)
    out = jax.block_until_ready(out)
    assert out.shape == (batch, out_features)

    # Tight check vs a reference using the identical prepared operands.
    ref = sine_layer_ref(x, w_p, b_p, n_valid, out.dtype)
    assert jnp.allclose(out, ref, atol=1e-3, rtol=1e-3), "mismatch vs matched ref"

    # Loose sanity check vs the full-f32 PyTorch-style computation.
    ref_f32 = jnp.maximum(omega_0 * (x @ weight_t + bias), 0.0)
    assert jnp.allclose(out, ref_f32, atol=0.5, rtol=0.05), "mismatch vs f32 ref"

    print("KERNEL_OK")
</pallas_src>

<mosaic_0001>
module attributes {stable_mosaic.version = 11 : i64} {
  func.func @_sine_kernel(%arg0: i32, %arg1: i32, %arg2: memref<128x32xf32, #tpu.memory_space<vmem>>, %arg3: memref<32x128xbf16, #tpu.memory_space<vmem>>, %arg4: memref<1x128xf32, #tpu.memory_space<vmem>>, %arg5: memref<128x128xf32, #tpu.memory_space<vmem>>) attributes {dimension_semantics = [#tpu.dimension_semantics<parallel>, #tpu.dimension_semantics<parallel>], iteration_bounds = array<i64: 4, 1>, scalar_prefetch = 0 : i64, scratch_operands = 0 : i64, tpu.core_type = #tpu.core_type<tc>, window_params = [{transform_indices = @transform_0, window_bounds = array<i64: 128, 32>}, {pipeline_mode = #tpu.pipeline_mode<synchronous>, transform_indices = @transform_1, window_bounds = array<i64: 32, 128>}, {pipeline_mode = #tpu.pipeline_mode<synchronous>, transform_indices = @transform_2, window_bounds = array<i64: 1, 128>}, {transform_indices = @transform_3, window_bounds = array<i64: 128, 128>}]} {
    %c0 = arith.constant 0 : index
    %c0_0 = arith.constant 0 : index
    %0 = vector.load %arg3[%c0, %c0_0] : memref<32x128xbf16, #tpu.memory_space<vmem>>, vector<32x128xbf16>
    %c0_1 = arith.constant 0 : index
    %c0_2 = arith.constant 0 : index
    %1 = vector.load %arg2[%c0_1, %c0_2] : memref<128x32xf32, #tpu.memory_space<vmem>>, vector<128x32xf32>
    %2 = arith.truncf %1 : vector<128x32xf32> to vector<128x32xbf16>
    %cst = arith.constant dense<0.000000e+00> : vector<128x128xf32>
    %3 = tpu.matmul %2, %0, %cst {dimension_numbers = #tpu.dot_dimension_numbers<[1], [0], [0], [1], [0, 0, 1, 1], [], []>} : vector<128x32xbf16>, vector<32x128xbf16>, vector<128x128xf32> -> vector<128x128xf32>
    %c0_3 = arith.constant 0 : index
    %c0_4 = arith.constant 0 : index
    %4 = vector.load %arg4[%c0_3, %c0_4] : memref<1x128xf32, #tpu.memory_space<vmem>>, vector<1x128xf32>
    %5 = vector.broadcast %4 : vector<1x128xf32> to vector<128x128xf32>
    %6 = arith.addf %3, %5 : vector<128x128xf32>
    %cst_5 = arith.constant 0.000000e+00 : f32
    %7 = vector.broadcast %cst_5 : f32 to vector<128x128xf32>
    %8 = arith.maximumf %6, %7 : vector<128x128xf32>
    %c0_6 = arith.constant 0 : index
    %c0_7 = arith.constant 0 : index
    %9 = vector.load %arg5[%c0_6, %c0_7] : memref<128x128xf32, #tpu.memory_space<vmem>>, vector<128x128xf32>
    tpu.vector_store %arg5[%c0_6, %c0_7], %8 {strides = array<i32>} : memref<128x128xf32, #tpu.memory_space<vmem>>, vector<128x128xf32>,
    return
  }
  func.func @transform_0(%arg0: i32, %arg1: i32) -> (i32, i32) {
    %c0_i32 = arith.constant 0 : i32
    %c0_i32_0 = arith.constant 0 : i32
    return %arg0, %c0_i32 : i32, i32
  }
  func.func @transform_1(%arg0: i32, %arg1: i32) -> (i32, i32) {
    %c0_i32 = arith.constant 0 : i32
    %c0_i32_0 = arith.constant 0 : i32
    return %c0_i32, %arg1 : i32, i32
  }
  func.func @transform_2(%arg0: i32, %arg1: i32) -> (i32, i32) {
    %c0_i32 = arith.constant 0 : i32
    %c0_i32_0 = arith.constant 0 : i32
    return %c0_i32, %arg1 : i32, i32
  }
  func.func @transform_3(%arg0: i32, %arg1: i32) -> (i32, i32) {
    %c0_i32 = arith.constant 0 : i32
    return %arg0, %arg1 : i32, i32
  }
}

</mosaic_0001>

<bundles_post_ra>
// kernel: tpu_custom_call.1
= control target key start
LH: loop header
LB: loop body
LE: loop exit
PB: predicated region body
PF: predicated region fallthrough
CT: control target
= control target key end

     0   :  { %8 = vsyncpa [#allocation3], 0  ;;  %s838_s0 = inlined_call_operand.vmem [shape: f32[512,32], index: 0, kind: input, shape index: {}]   ;;  %s839_s1 = inlined_call_operand.vmem [shape: bf16[32,128], index: 1, kind: input, shape index: {}]   ;;  %s840_s2 = inlined_call_operand.vmem [shape: f32[1,128], index: 2, kind: input, shape index: {}]   ;;  %s841_s3 = inlined_call_operand.hbm [shape: f32[512,128], index: 3, kind: output, shape index: {}]  }
   0x1   :  { %10 = vsyncpa [#allocation3 + $0x1], 0  ;;  %s684_s12 = smov 0   ;;  %s686_s13 = smov 0  }
   0x2   :  { %s688_s14 = smov 0   ;;  %s690_s15 = smov 0  }
   0x3   :  { %s692_s16 = smov 0   ;;  %s694_s17 = smov 0  }
   0x4 LB: > { %s484_s18 = sadd.s32 4294967295, %s660_s17   ;;  %s485_s19 = sadd.s32 4294967294, %s660_s17   ;;  %s660_s17 = sphi %s694_s17, %s16_s17   ;;  %s656_s16 = sphi %s692_s16, %s848_s16   ;;  %s652_s15 = sphi %s690_s15, %s847_s15   ;;  %s648_s14 = sphi %s688_s14, %s846_s14   ;;  %s644_s13 = sphi %s686_s13, %s845_s13   ;;  %s640_s12 = sphi %s684_s12, %s844_s12  }
   0x5   : > { %s28_s20 = sadd.s32 1, %s656_s16  ;;  %s115_s21 = sadd.s32 1, %s648_s14 }
   0x6   : > { %p30_p0 = scmp.ge.s32.totalorder %s28_s20, 4  ;;  %p125_p1 = scmp.ne.s32.totalorder %s648_s14, %s644_s13 }
   0x7   : > { %p126_p2 = scmp.eq.s32.totalorder %s484_s18, 3  ;;  %p131_p3 = scmp.ne.s32.totalorder %s644_s13, %s640_s12 }
   0x8   : > { %s850_s20 = smov (%p30_p0, %s28_s20), 0  ;;  %p132_p5 = scmp.eq.s32.totalorder %s485_s19, 3 }
   0x9   : > { %p724_p4 = por %p126_p2, %p125_p1  ;;  %s110_s23 = ssub.s32 %s656_s16, %s850_s20 }
   0xa   : > { %p490_p6 = scmp.ge.s32.totalorder %s660_s17, 1  ;;  %p113_p7 = scmp.eq.s32.totalorder %s110_s23, 0 }
   0xb   : > { %p731_p8 = por %p132_p5, %p131_p3  ;;  %p172_p9 = scmp.lt.s32.totalorder %s660_s17, 5 }
   0xc   : > { %s737_s25 = scalar_select %p113_p7, %s648_s14, %s115_s21  }
   0xd   : > { %p173_p10 = pnand %p490_p6, %p172_p9 }
   0xe   : > { %s492_s28 = sshll.u32 (!%p173_p10), %s652_s15, 4  ;;  %s200_s8 = sand.u32 (!%p173_p10), 1, %s644_s13  }
   0xf   : > { %176 = sbr.rel (%p173_p10) target bundleno = 194 (0xc2), region = 32  ;;  %p204_p11 = scmp.lt.s32.totalorder (!%p173_p10), %s492_s28, 63 }
  0x10   : > { %s491_s11 = sshll.u32 (!%p173_p10), %s200_s8, 7  ;;  %s517_s19 = sshll.u32 (!%p173_p10), %s652_s15, 7 }
  0x11   : > { %s767_s18 = scalar_lea.vmem (!%p173_p10), [#allocation2], %s491_s11  ;;  %s381_s26 = scalar_lea.hbm (!%p173_p10), %s841_s3, %s517_s19 }
  0x12   : > { %s382_s27 = sshll.u32 (!%p173_p10), %s767_s18, 4  ;;  %s384_s15 = sshll.u32 (!%p173_p10), %s381_s26, 4  ;;  %s383_s27 = int_to_ptr.vmem [resolvable:$true] %s382_s27  ;;  %s385_s15 = int_to_ptr.hbm [resolvable:$true] %s384_s15 }
  0x13   : > { %s596_s29 = sshra.s32 (!%p173_p10), %s385_s15, 4  ;;  %s602_s6 = scalar_lea.hbm (!%p173_p10), %s841_s3, 512  ;;  %s597_s29 = int_to_ptr.hbm [resolvable:$true] %s596_s29 }
  0x14   : > { %v516_v0 = vld [vmem:[%s839_s1 + $0x8] sm:$0xff]  ;;  %v515_v1 = vld [vmem:[%s839_s1] sm:$0xff]  ;;  %s852_s28 = smov (!%p204_p11, %s492_s28), 63  ;;  %vm262_vm0 = vcmask 261120   ;;  %s598_s30 = scalar_lea.hbm %s597_s29, 128 }
  0x15   : > { %293 = vmatpush.bf16.msra.mxu0 %v516_v0  ;;  %518 = vmatpush.bf16.msra.mxu1 %v516_v0  ;;  %s493_s4 = sshll.u32 %s852_s28, 3  ;;  %v761_v26 = vld [vmem:[%s840_s2] ss:$0 sm:$0xff]  ;;  %s369_s28 = scalar_lea.sflag [#allocation3], %s200_s8 }
  0x16   : > { %519 = vmatpush.bf16.msra.mxu2 %v516_v0  ;;  %520 = vmatpush.bf16.msra.mxu3 %v516_v0  ;;  %s207_s7 = scalar_lea.vmem %s838_s0, %s493_s4  ;;  %p599_p12 = scmp.ne.s32.totalorder %s597_s29, %s598_s30 }
  0x17   : > { %v222_v2 = vld [vmem:[%s207_s7] sm:$0xff]  ;;  %v223_v3 = vld [vmem:[%s207_s7 + $0x8] sm:$0xff]  ;;  %v224_v14 = vld [vmem:[%s207_s7 + $0x10] sm:$0xff]  ;;  %p603_p1 = scmp.lt.s32.totalorder %s597_s29, %s841_s3  ;;  %p604_p2 = scmp.lt.s32.totalorder %s602_s6, %s598_s30 }
  0x18   : > { %v226_v4 = vld [vmem:[%s207_s7 + $0x20] sm:$0xff]  ;;  %v238_v5 = vpack.c.bf16 %v223_v3, %v222_v2  ;;  %v227_v6 = vld [vmem:[%s207_s7 + $0x28] sm:$0xff]  ;;  %v225_v15 = vld [vmem:[%s207_s7 + $0x18] sm:$0xff]  ;;  %p600_p13 = pnand %p599_p12, %p724_p4 }
  0x19   : > { %294 = vmatpush.bf16.msra.mxu0 %v515_v1  ;;  %521 = vmatpush.bf16.msra.mxu1 %v515_v1  ;;  %v230_v7 = vld [vmem:[%s207_s7 + $0x40] sm:$0xff]  ;;  %v231_v8 = vld [vmem:[%s207_s7 + $0x48] sm:$0xff]  ;;  %v240_v9 = vpack.c.bf16 %v227_v6, %v226_v4  ;;  %v228_v16 = vld [vmem:[%s207_s7 + $0x30] sm:$0xff]  ;;  %v239_v22 = vpack.c.bf16 %v225_v15, %v224_v14  ;;  %p605_p3 = por %p604_p2, %p603_p1 }
  0x1a   : > { %522 = vmatpush.bf16.msra.mxu2 %v515_v1  ;;  %523 = vmatpush.bf16.msra.mxu3 %v515_v1  ;;  %v242_v10 = vpack.c.bf16 %v231_v8, %v230_v7  ;;  %v234_v11 = vld [vmem:[%s207_s7 + $0x60] sm:$0xff]  ;;  %v235_v12 = vld [vmem:[%s207_s7 + $0x68] sm:$0xff]  ;;  %v229_v17 = vld [vmem:[%s207_s7 + $0x38] sm:$0xff]  ;;  %p601_p0 = pneg %p600_p13 }
  0x1b   : > { %v244_v13 = vpack.c.bf16 %v235_v12, %v234_v11  ;;  %v232_v18 = vld [vmem:[%s207_s7 + $0x50] sm:$0xff]  ;;  %v233_v19 = vld [vmem:[%s207_s7 + $0x58] sm:$0xff]  ;;  %v241_v23 = vpack.c.bf16 %v229_v17, %v228_v16 }
  0x1c   : > { %502 = vmatmul.msk.bf16.vlgmr.msra.gmra.mxu0 %vm262_vm0, %v238_v5  ;;  %504 = vmatmul.msk.bf16.vlgmr.msra.gmra.mxu1 %vm262_vm0, %v240_v9  ;;  %v236_v20 = vld [vmem:[%s207_s7 + $0x70] sm:$0xff]  ;;  %v237_v21 = vld [vmem:[%s207_s7 + $0x78] sm:$0xff]  ;;  %v243_v24 = vpack.c.bf16 %v233_v19, %v232_v18  ;;  %p606_p5 = pnand %p605_p3, %p601_p0 }
  0x1d   : > { %506 = vmatmul.msk.bf16.vlgmr.msra.gmra.mxu2 %vm262_vm0, %v242_v10  ;;  %508 = vmatmul.msk.bf16.vlgmr.msra.gmra.mxu3 %vm262_vm0, %v244_v13  ;;  %v245_v25 = vpack.c.bf16 %v237_v21, %v236_v20 }
  0x2c   : > { %503 = vmatmul.msk.bf16.gmra.mxu0 %vm262_vm0, %v239_v22  ;;  %505 = vmatmul.msk.bf16.gmra.mxu1 %vm262_vm0, %v241_v23 }
  0x2d   : > { %507 = vmatmul.msk.bf16.gmra.mxu2 %vm262_vm0, %v243_v24  ;;  %509 = vmatmul.msk.bf16.gmra.mxu3 %vm262_vm0, %v245_v25 }
  0x99   : > { %v296_v27 = vpop.f32.mrf.mxu0  ;;  %v306_v29 = vpop.f32.mrf.mxu1 }
  0x9a   : > { %v297_v28 = vadd.f32 %v761_v26, %v296_v27  ;;  %v307_v30 = vadd.f32 %v761_v26, %v306_v29 }
  0x9c   : > { %v336_v31 = vmax.f32 %v297_v28, 0.0  ;;  %v340_v32 = vmax.f32 %v307_v30, 0.0 }
  0x9e   : > { %352 = vst [vmem:[%s767_s18] sm:$0xff] %v336_v31 }
  0x9f   : > { %356 = vst [vmem:[%s767_s18 + $0x20] sm:$0xff] %v340_v32 }
  0xa0   : > { %v316_v33 = vpop.f32.mrf.mxu2  ;;  %v326_v35 = vpop.f32.mrf.mxu3 }
  0xa1   : > { %v317_v34 = vadd.f32 %v761_v26, %v316_v33  ;;  %v298_v36 = vpop.f32.mrf.mxu0  ;;  %v327_v37 = vadd.f32 %v761_v26, %v326_v35  ;;  %v308_v39 = vpop.f32.mrf.mxu1 }
  0xa2   : > { %v299_v38 = vadd.f32 %v761_v26, %v298_v36  ;;  %v309_v41 = vadd.f32 %v761_v26, %v308_v39 }
  0xa3   : > { %v344_v40 = vmax.f32 %v317_v34, 0.0  ;;  %v348_v42 = vmax.f32 %v327_v37, 0.0 }
  0xa4   : > { %v337_v43 = vmax.f32 %v299_v38, 0.0  ;;  %v341_v44 = vmax.f32 %v309_v41, 0.0 }
  0xa5   : > { %360 = vst [vmem:[%s767_s18 + $0x40] sm:$0xff] %v344_v40 }
  0xa6   : > { %364 = vst [vmem:[%s767_s18 + $0x60] sm:$0xff] %v348_v42 }
  0xa7   : > { %353 = vst [vmem:[%s767_s18 + $0x8] sm:$0xff] %v337_v43 }
  0xa8   : > { %357 = vst [vmem:[%s767_s18 + $0x28] sm:$0xff] %v341_v44  ;;  %v318_v45 = vpop.f32.mrf.mxu2  ;;  %v328_v47 = vpop.f32.mrf.mxu3 }
  0xa9   : > { %v319_v46 = vadd.f32 %v761_v26, %v318_v45  ;;  %v301_v48 = vpop.f32.mrf.mxu0  ;;  %v329_v49 = vadd.f32 %v761_v26, %v328_v47  ;;  %v311_v51 = vpop.f32.mrf.mxu1 }
  0xaa   : > { %v302_v50 = vadd.f32 %v761_v26, %v301_v48  ;;  %v312_v53 = vadd.f32 %v761_v26, %v311_v51 }
  0xab   : > { %v345_v52 = vmax.f32 %v319_v46, 0.0  ;;  %v349_v54 = vmax.f32 %v329_v49, 0.0 }
  0xac   : > { %v338_v55 = vmax.f32 %v302_v50, 0.0  ;;  %v342_v56 = vmax.f32 %v312_v53, 0.0 }
  0xad   : > { %361 = vst [vmem:[%s767_s18 + $0x48] sm:$0xff] %v345_v52 }
  0xae   : > { %365 = vst [vmem:[%s767_s18 + $0x68] sm:$0xff] %v349_v54 }
  0xaf   : > { %354 = vst [vmem:[%s767_s18 + $0x10] sm:$0xff] %v338_v55 }
  0xb0   : > { %358 = vst [vmem:[%s767_s18 + $0x30] sm:$0xff] %v342_v56  ;;  %v321_v57 = vpop.f32.mrf.mxu2  ;;  %v331_v59 = vpop.f32.mrf.mxu3 }
  0xb1   : > { %v322_v58 = vadd.f32 %v761_v26, %v321_v57  ;;  %v303_v60 = vpop.f32.mrf.mxu0  ;;  %v332_v61 = vadd.f32 %v761_v26, %v331_v59  ;;  %v313_v63 = vpop.f32.mrf.mxu1 }
  0xb2   : > { %v304_v62 = vadd.f32 %v761_v26, %v303_v60  ;;  %v314_v1 = vadd.f32 %v761_v26, %v313_v63 }
  0xb3   : > { %v346_v0 = vmax.f32 %v322_v58, 0.0  ;;  %v350_v2 = vmax.f32 %v332_v61, 0.0 }
  0xb4   : > { %v339_v3 = vmax.f32 %v304_v62, 0.0  ;;  %v343_v4 = vmax.f32 %v314_v1, 0.0 }
  0xb5   : > { %362 = vst [vmem:[%s767_s18 + $0x50] sm:$0xff] %v346_v0 }
  0xb6   : > { %366 = vst [vmem:[%s767_s18 + $0x70] sm:$0xff] %v350_v2 }
  0xb7   : > { %355 = vst [vmem:[%s767_s18 + $0x18] sm:$0xff] %v339_v3 }
  0xb8   : > { %359 = vst [vmem:[%s767_s18 + $0x38] sm:$0xff] %v343_v4  ;;  %v323_v5 = vpop.f32.mrf.mxu2  ;;  %v333_v7 = vpop.f32.mrf.mxu3 }
  0xb9   : > { %v324_v6 = vadd.f32 %v761_v26, %v323_v5  ;;  %v334_v8 = vadd.f32 %v761_v26, %v333_v7 }
  0xbb   : > { %v347_v9 = vmax.f32 %v324_v6, 0.0  ;;  %v351_v10 = vmax.f32 %v334_v8, 0.0 }
  0xbd   : > { %363 = vst [vmem:[%s767_s18 + $0x58] sm:$0xff] %v347_v9 }
  0xbe   : > { %367 = vst [vmem:[%s767_s18 + $0x78] sm:$0xff] %v351_v10 }
  0xbf   : > { %609 = shalt.err (!%p606_p5)
}
  0xc0   : > { %s662_s8 = smov 128   ;;  %s663_s10 = smov 8  }
  0xc1   : > { %524 = dma.vmem_to_hbm [thread:$0]  (%p724_p4), %s383_s27, 2048, %s385_s15, %s369_s28, %s662_s8, %s662_s8, %s663_s10  }
  0xc2 PF: > { %p530_p6 = scmp.ge.s32.totalorder %s660_s17, 2  ;;  %s399_s11 = sand.u32 1, %s640_s12  }
  0xc3   : > { %s400_s18 = scalar_lea.sflag [#allocation3], %s399_s11 }
  0xc4   : > { %p527_p7 = pnand %p530_p6, %p731_p8 }
  0xc6   : > { %p528_p9 = pneg %p527_p7 }
  0xc8   : > { %635 = dma.done.wait (%p528_p9), %s400_s18, 2048  }
  0xc9   : > { %637 = vsyncadd (%p528_p9), %s400_s18, 4294965248  ;;  %s16_s17 = sadd.s32 1, %s660_s17   ;;  %s844_s12 = smov %s644_s13 }
  0xca   : > { %p13_p10 = scmp.ge.s32.totalorder %s16_s17, 6   ;;  %s845_s13 = smov %s648_s14 }
  0xcb   : > { %s846_s14 = smov %s737_s25  ;;  %s847_s15 = smov %s656_s16 }
  0xcc   : > { %s848_s16 = smov %s850_s20  ;;  %15 = sbr.rel (!%p13_p10) target bundleno = 4 (0x4), region = 73 }
  0xd1   :  { %406 = vsyncpa [#allocation3], 1 }
  0xd2   :  { %408 = vsyncpa [#allocation3 + $0x1], 1 }

</bundles_post_ra>
